<compile_context>
chip_gen: v7x
topology: tpu7x:2x2x1
jax: 0.10.0
libtpu: 0.0.40
codegen_flags: <defaults>
</compile_context>

<pallas_src>
import functools

import jax
import jax.numpy as jnp
import numpy as np
from jax import lax
from jax.experimental import pallas as pl
from jax.experimental.pallas import tpu as pltpu


def _silu(z):
    # EUP path: exp + approx reciprocal, no VPU divide.
    return z * pl.reciprocal(1.0 + jnp.exp(-z), approx=True)


def resblock_kernel(hi_ref, wi_ref, x_ref, w1_ref, t1_ref, w2_ref, t2_ref,
                    o_ref, *, H, W):
    """One batch-chunk (Nb images folded into lanes) per grid step.

    hi_ref: (1, LW)       int32  per-lane image-row index   (precomputed)
    wi_ref: (1, LW)       int32  per-lane image-col index   (precomputed)
    x_ref : (Cin, LW)     f32    LW = Nb * H * W
    w1_ref: (Cp, Cin)     bf16   1x1 conv weight, BN1 scale folded, Cmid padded->Cp
    t1_ref: (Cp, 1)       f32    folded BN1 shift (conv bias folded in)
    w2_ref: (Cin, 9*Cp)   bf16   3x3 conv weight, tap-major (ky,kx,cmid), BN2 scale folded
    t2_ref: (Cin, 1)      f32    folded BN2 shift (conv bias folded in)
    o_ref : (Cin, LW)     f32
    """
    x = x_ref[...]                                           # (Cin, LW) f32
    LW = x.shape[1]

    # ---- cv1: 1x1 conv (channel matmul, bf16 in / f32 acc) -> shift -> SiLU ----
    y1 = jnp.dot(w1_ref[...], x.astype(jnp.bfloat16),
                 preferred_element_type=jnp.float32)         # (Cp, LW) f32
    y1 = _silu(y1 + t1_ref[...])                             # padded rows stay 0
    y1b = y1.astype(jnp.bfloat16)

    # ---- edge-validity masks: 4 compares hoisted out of the tap loop ----
    hi = hi_ref[...]                                         # (1, LW) int32
    wi = wi_ref[...]
    h_ok = {-1: hi >= 1, 1: hi < (H - 1)}
    w_ok = {-1: wi >= 1, 1: wi < (W - 1)}

    # ---- cv2: 3x3 conv (pad=1) as ONE K=9*Cp matmul over rolled taps ----
    taps = []
    for oy in (-1, 0, 1):
        for ox in (-1, 0, 1):
            if oy == 0 and ox == 0:
                taps.append(y1b)
                continue
            shift = (-(oy * W + ox)) % LW
            rolled = pltpu.roll(y1, shift=shift, axis=1)     # XLU slot (f32)
            if oy == 0:
                valid = w_ok[ox]
            elif ox == 0:
                valid = h_ok[oy]
            else:
                valid = h_ok[oy] & w_ok[ox]
            masked = jnp.where(valid, rolled, 0.0)           # f32 select (v5e-native)
            taps.append(masked.astype(jnp.bfloat16))
    taps = jnp.concatenate(taps, axis=0)                     # (9*Cp, LW) bf16, tile-aligned

    y2 = jnp.dot(w2_ref[...], taps,
                 preferred_element_type=jnp.float32)         # (Cin, LW) f32
    y2 = _silu(y2 + t2_ref[...])

    # ---- residual add (f32), lane-dense store ----
    o_ref[...] = (x + y2).astype(o_ref.dtype)


def _pick_nb(n, hw, target_lanes=2048):
    """Images per grid step: big enough to amortize per-step overhead,
    but keep >= 2 grid steps (v7x dual TensorCores) when N >= 2."""
    nb = max(1, min(n, max(1, target_lanes // hw)))
    while n % nb:
        nb -= 1
    if n >= 2 and n // nb < 2:
        nb = max(1, n // 2)
        while n % nb:
            nb -= 1
    return nb


def resblock_pallas(x_nchw, params):
    """x_nchw: (N, Cin, H, W) float32; returns (N, Cin, H, W)."""
    w1, t1, w2, t2 = params
    N, Cin, H, W = x_nchw.shape
    HW = H * W
    Cp = w1.shape[0]

    nb = _pick_nb(N, HW)
    G = N // nb
    LW = nb * HW

    # Fold batch into the lane axis: (Cin, N*HW), batch-major in lanes.
    x_flat = jnp.transpose(x_nchw.reshape(N, Cin, HW), (1, 0, 2)).reshape(Cin, N * HW)

    # Per-lane (h, w) indices; pattern repeats every HW lanes so one block
    # serves every grid step (index_map -> (0, 0)).
    lane_in_img = np.arange(LW, dtype=np.int32) % HW
    hi = jnp.asarray((lane_in_img // W).reshape(1, LW))
    wi = jnp.asarray((lane_in_img % W).reshape(1, LW))

    out = pl.pallas_call(
        functools.partial(resblock_kernel, H=H, W=W),
        out_shape=jax.ShapeDtypeStruct((Cin, N * HW), x_flat.dtype),
        grid=(G,),
        in_specs=[
            pl.BlockSpec((1, LW), lambda g: (0, 0)),           # hi
            pl.BlockSpec((1, LW), lambda g: (0, 0)),           # wi
            pl.BlockSpec((Cin, LW), lambda g: (0, g)),         # x chunk
            pl.BlockSpec((Cp, Cin), lambda g: (0, 0)),         # w1 (scale folded)
            pl.BlockSpec((Cp, 1), lambda g: (0, 0)),           # t1
            pl.BlockSpec((Cin, 9 * Cp), lambda g: (0, 0)),     # w2 (scale folded)
            pl.BlockSpec((Cin, 1), lambda g: (0, 0)),          # t2
        ],
        out_specs=pl.BlockSpec((Cin, LW), lambda g: (0, g)),
        compiler_params=pltpu.CompilerParams(
            dimension_semantics=("parallel",)),
    )(hi, wi, x_flat, w1, t1, w2, t2)

    return jnp.transpose(out.reshape(Cin, N, HW), (1, 0, 2)).reshape(N, Cin, H, W)


# ----------------------------- reference (pure JAX) -----------------------------
def _silu_ref(z):
    return z * jax.nn.sigmoid(z)


def _conv_bn_silu_ref(x, w_oihw, b, gamma, beta, mean, var, pad, eps=1e-5):
    z = lax.conv_general_dilated(
        x, w_oihw, window_strides=(1, 1), padding=[(pad, pad), (pad, pad)],
        dimension_numbers=("NCHW", "OIHW", "NCHW"))
    z = z + b[None, :, None, None]
    z = (z - mean[None, :, None, None]) / jnp.sqrt(var[None, :, None, None] + eps)
    z = z * gamma[None, :, None, None] + beta[None, :, None, None]
    return _silu_ref(z)


def resblock_ref(x, p):
    y = _conv_bn_silu_ref(x, p["w1_oihw"], p["b1"], p["g1"], p["be1"],
                          p["m1"], p["v1"], pad=0)
    y = _conv_bn_silu_ref(y, p["w2_oihw"], p["b2"], p["g2"], p["be2"],
                          p["m2"], p["v2"], pad=1)
    return x + y


# ----------------------------- parameter setup -----------------------------
def make_params(key, cin, expansion=0.5, eps=1e-5):
    c_ = int(cin * expansion)
    ks = jax.random.split(key, 12)
    p = {
        # PyTorch-layout conv weights (OIHW) + biases
        "w1_oihw": jax.random.normal(ks[0], (c_, cin, 1, 1), jnp.float32) / np.sqrt(cin),
        "b1": jax.random.normal(ks[1], (c_,), jnp.float32) * 0.1,
        "w2_oihw": jax.random.normal(ks[2], (cin, c_, 3, 3), jnp.float32) / np.sqrt(9 * c_),
        "b2": jax.random.normal(ks[3], (cin,), jnp.float32) * 0.1,
        # BatchNorm (eval-mode) parameters / running stats
        "g1": 1.0 + 0.2 * jax.random.normal(ks[4], (c_,), jnp.float32),
        "be1": 0.1 * jax.random.normal(ks[5], (c_,), jnp.float32),
        "m1": 0.1 * jax.random.normal(ks[6], (c_,), jnp.float32),
        "v1": 0.5 + jax.random.uniform(ks[7], (c_,), jnp.float32),
        "g2": 1.0 + 0.2 * jax.random.normal(ks[8], (cin,), jnp.float32),
        "be2": 0.1 * jax.random.normal(ks[9], (cin,), jnp.float32),
        "m2": 0.1 * jax.random.normal(ks[10], (cin,), jnp.float32),
        "v2": 0.5 + jax.random.uniform(ks[11], (cin,), jnp.float32),
    }
    # Folded BN scale/shift (f32).
    s1 = p["g1"] / jnp.sqrt(p["v1"] + eps)
    t1 = p["be1"] + (p["b1"] - p["m1"]) * s1
    s2 = p["g2"] / jnp.sqrt(p["v2"] + eps)
    t2 = p["be2"] + (p["b2"] - p["m2"]) * s2

    # Fold BN scales into the conv weights host-side (f32 math, then bf16 cast).
    w1_f = p["w1_oihw"][:, :, 0, 0] * s1[:, None]            # (Cmid, Cin)
    w2_f = p["w2_oihw"] * s2[:, None, None, None]            # (Cin, Cmid, 3, 3)

    # Pad Cmid to a bf16 sublane multiple (16) so the 9-way tap concat is tile-aligned.
    cp = -(-c_ // 16) * 16
    pad = cp - c_
    w1_k = jnp.pad(w1_f, ((0, pad), (0, 0))).astype(jnp.bfloat16)        # (Cp, Cin)
    t1_k = jnp.pad(t1, ((0, pad),))[:, None]                              # (Cp, 1)
    w2_k = jnp.pad(jnp.transpose(w2_f, (0, 2, 3, 1)),                     # (Cin, ky, kx, Cmid)
                   ((0, 0), (0, 0), (0, 0), (0, pad)))
    w2_k = w2_k.reshape(cin, 9 * cp).astype(jnp.bfloat16)                 # (Cin, 9*Cp)

    kernel_params = (w1_k, t1_k, w2_k, t2[:, None])
    return p, kernel_params


if __name__ == "__main__":
    # TODO(synk): learned_shortcut=True branch (two scalar gates) not implemented;
    # default ResBlock path (x + cv2(cv1(x))) only.
    N, Cin, H, W = 2, 8, 16, 16          # cin=8, expansion=0.5 -> c_=4
    key = jax.random.PRNGKey(0)
    kx, kp = jax.random.split(key)
    x = jax.random.normal(kx, (N, Cin, H, W), jnp.float32)

    ref_params, kernel_params = make_params(kp, Cin, expansion=0.5)

    out = jax.block_until_ready(
        jax.jit(functools.partial(resblock_pallas, params=kernel_params))(x))

    ref = jax.block_until_ready(resblock_ref(x, ref_params))

    max_err = float(jnp.max(jnp.abs(out - ref)))
    assert out.shape == x.shape and out.dtype == x.dtype
    assert max_err < 5e-2, f"max abs error too large: {max_err}"
    print("KERNEL_OK")
</pallas_src>

<mosaic_0001>
module attributes {stable_mosaic.version = 11 : i64} {
  func.func @resblock_kernel(%arg0: i32, %arg1: memref<1x256xi32, #tpu.memory_space<vmem>>, %arg2: memref<1x256xi32, #tpu.memory_space<vmem>>, %arg3: memref<8x256xf32, #tpu.memory_space<vmem>>, %arg4: memref<16x8xbf16, #tpu.memory_space<vmem>>, %arg5: memref<16x1xf32, #tpu.memory_space<vmem>>, %arg6: memref<8x144xbf16, #tpu.memory_space<vmem>>, %arg7: memref<8x1xf32, #tpu.memory_space<vmem>>, %arg8: memref<8x256xf32, #tpu.memory_space<vmem>>) attributes {dimension_semantics = [#tpu.dimension_semantics<parallel>], iteration_bounds = array<i64: 2>, scalar_prefetch = 0 : i64, scratch_operands = 0 : i64, tpu.core_type = #tpu.core_type<tc>, window_params = [{pipeline_mode = #tpu.pipeline_mode<synchronous>, transform_indices = @transform_0, window_bounds = array<i64: 1, 256>}, {pipeline_mode = #tpu.pipeline_mode<synchronous>, transform_indices = @transform_1, window_bounds = array<i64: 1, 256>}, {transform_indices = @transform_2, window_bounds = array<i64: 8, 256>}, {pipeline_mode = #tpu.pipeline_mode<synchronous>, transform_indices = @transform_3, window_bounds = array<i64: 16, 8>}, {pipeline_mode = #tpu.pipeline_mode<synchronous>, transform_indices = @transform_4, window_bounds = array<i64: 16, 1>}, {pipeline_mode = #tpu.pipeline_mode<synchronous>, transform_indices = @transform_5, window_bounds = array<i64: 8, 144>}, {pipeline_mode = #tpu.pipeline_mode<synchronous>, transform_indices = @transform_6, window_bounds = array<i64: 8, 1>}, {transform_indices = @transform_7, window_bounds = array<i64: 8, 256>}]} {
    %c0 = arith.constant 0 : index
    %c0_0 = arith.constant 0 : index
    %0 = vector.load %arg3[%c0, %c0_0] : memref<8x256xf32, #tpu.memory_space<vmem>>, vector<8x256xf32>
    %c0_1 = arith.constant 0 : index
    %c0_2 = arith.constant 0 : index
    %1 = vector.load %arg4[%c0_1, %c0_2] : memref<16x8xbf16, #tpu.memory_space<vmem>>, vector<16x8xbf16>
    %2 = arith.truncf %0 : vector<8x256xf32> to vector<8x256xbf16>
    %cst = arith.constant dense<0.000000e+00> : vector<16x256xf32>
    %3 = tpu.matmul %1, %2, %cst {dimension_numbers = #tpu.dot_dimension_numbers<[1], [0], [0], [1], [0, 0, 1, 1], [], []>} : vector<16x8xbf16>, vector<8x256xbf16>, vector<16x256xf32> -> vector<16x256xf32>
    %c0_3 = arith.constant 0 : index
    %c0_4 = arith.constant 0 : index
    %4 = vector.load %arg5[%c0_3, %c0_4] : memref<16x1xf32, #tpu.memory_space<vmem>>, vector<16x1xf32>
    %5 = vector.broadcast %4 : vector<16x1xf32> to vector<16x256xf32>
    %6 = arith.addf %3, %5 : vector<16x256xf32>
    %cst_5 = arith.constant 0.000000e+00 : f32
    %7 = vector.broadcast %cst_5 : f32 to vector<16x256xf32>
    %8 = arith.subf %7, %6 : vector<16x256xf32>
    %9 = math.exp %8 : vector<16x256xf32>
    %cst_6 = arith.constant 1.000000e+00 : f32
    %10 = vector.broadcast %cst_6 : f32 to vector<16x256xf32>
    %11 = arith.addf %10, %9 : vector<16x256xf32>
    %12 = tpu.reciprocal %11 {approx = true} : vector<16x256xf32> -> vector<16x256xf32>
    %13 = arith.mulf %6, %12 : vector<16x256xf32>
    %14 = arith.truncf %13 : vector<16x256xf32> to vector<16x256xbf16>
    %c0_7 = arith.constant 0 : index
    %c0_8 = arith.constant 0 : index
    %15 = vector.load %arg1[%c0_7, %c0_8] : memref<1x256xi32, #tpu.memory_space<vmem>>, vector<1x256xi32>
    %c0_9 = arith.constant 0 : index
    %c0_10 = arith.constant 0 : index
    %16 = vector.load %arg2[%c0_9, %c0_10] : memref<1x256xi32, #tpu.memory_space<vmem>>, vector<1x256xi32>
    %c1_i32 = arith.constant 1 : i32
    %17 = vector.broadcast %c1_i32 : i32 to vector<1x256xi32>
    %18 = arith.cmpi sge, %15, %17 : vector<1x256xi32>
    %c15_i32 = arith.constant 15 : i32
    %19 = vector.broadcast %c15_i32 : i32 to vector<1x256xi32>
    %20 = arith.cmpi slt, %15, %19 : vector<1x256xi32>
    %c1_i32_11 = arith.constant 1 : i32
    %21 = vector.broadcast %c1_i32_11 : i32 to vector<1x256xi32>
    %22 = arith.cmpi sge, %16, %21 : vector<1x256xi32>
    %c15_i32_12 = arith.constant 15 : i32
    %23 = vector.broadcast %c15_i32_12 : i32 to vector<1x256xi32>
    %24 = arith.cmpi slt, %16, %23 : vector<1x256xi32>
    %c17_i32 = arith.constant 17 : i32
    %25 = tpu.dynamic_rotate %13 by %c17_i32 dim 1 : vector<16x256xf32>, i32 -> vector<16x256xf32>
    %26 = arith.andi %18, %22 : vector<1x256xi1>
    %cst_13 = arith.constant 0.000000e+00 : f32
    %27 = vector.shape_cast %26 : vector<1x256xi1> to vector<1x256xi1>
    %28 = vector.broadcast %27 : vector<1x256xi1> to vector<16x256xi1>
    %29 = vector.broadcast %cst_13 : f32 to vector<16x256xf32>
    %30 = arith.select %28, %25, %29 : vector<16x256xi1>, vector<16x256xf32>
    %31 = arith.truncf %30 : vector<16x256xf32> to vector<16x256xbf16>
    %c16_i32 = arith.constant 16 : i32
    %32 = tpu.dynamic_rotate %13 by %c16_i32 dim 1 : vector<16x256xf32>, i32 -> vector<16x256xf32>
    %cst_14 = arith.constant 0.000000e+00 : f32
    %33 = vector.shape_cast %18 : vector<1x256xi1> to vector<1x256xi1>
    %34 = vector.broadcast %33 : vector<1x256xi1> to vector<16x256xi1>
    %35 = vector.broadcast %cst_14 : f32 to vector<16x256xf32>
    %36 = arith.select %34, %32, %35 : vector<16x256xi1>, vector<16x256xf32>
    %37 = arith.truncf %36 : vector<16x256xf32> to vector<16x256xbf16>
    %c15_i32_15 = arith.constant 15 : i32
    %38 = tpu.dynamic_rotate %13 by %c15_i32_15 dim 1 : vector<16x256xf32>, i32 -> vector<16x256xf32>
    %39 = arith.andi %18, %24 : vector<1x256xi1>
    %cst_16 = arith.constant 0.000000e+00 : f32
    %40 = vector.shape_cast %39 : vector<1x256xi1> to vector<1x256xi1>
    %41 = vector.broadcast %40 : vector<1x256xi1> to vector<16x256xi1>
    %42 = vector.broadcast %cst_16 : f32 to vector<16x256xf32>
    %43 = arith.select %41, %38, %42 : vector<16x256xi1>, vector<16x256xf32>
    %44 = arith.truncf %43 : vector<16x256xf32> to vector<16x256xbf16>
    %c1_i32_17 = arith.constant 1 : i32
    %45 = tpu.dynamic_rotate %13 by %c1_i32_17 dim 1 : vector<16x256xf32>, i32 -> vector<16x256xf32>
    %cst_18 = arith.constant 0.000000e+00 : f32
    %46 = vector.shape_cast %22 : vector<1x256xi1> to vector<1x256xi1>
    %47 = vector.broadcast %46 : vector<1x256xi1> to vector<16x256xi1>
    %48 = vector.broadcast %cst_18 : f32 to vector<16x256xf32>
    %49 = arith.select %47, %45, %48 : vector<16x256xi1>, vector<16x256xf32>
    %50 = arith.truncf %49 : vector<16x256xf32> to vector<16x256xbf16>
    %c255_i32 = arith.constant 255 : i32
    %51 = tpu.dynamic_rotate %13 by %c255_i32 dim 1 : vector<16x256xf32>, i32 -> vector<16x256xf32>
    %cst_19 = arith.constant 0.000000e+00 : f32
    %52 = vector.shape_cast %24 : vector<1x256xi1> to vector<1x256xi1>
    %53 = vector.broadcast %52 : vector<1x256xi1> to vector<16x256xi1>
    %54 = vector.broadcast %cst_19 : f32 to vector<16x256xf32>
    %55 = arith.select %53, %51, %54 : vector<16x256xi1>, vector<16x256xf32>
    %56 = arith.truncf %55 : vector<16x256xf32> to vector<16x256xbf16>
    %c241_i32 = arith.constant 241 : i32
    %57 = tpu.dynamic_rotate %13 by %c241_i32 dim 1 : vector<16x256xf32>, i32 -> vector<16x256xf32>
    %58 = arith.andi %20, %22 : vector<1x256xi1>
    %cst_20 = arith.constant 0.000000e+00 : f32
    %59 = vector.shape_cast %58 : vector<1x256xi1> to vector<1x256xi1>
    %60 = vector.broadcast %59 : vector<1x256xi1> to vector<16x256xi1>
    %61 = vector.broadcast %cst_20 : f32 to vector<16x256xf32>
    %62 = arith.select %60, %57, %61 : vector<16x256xi1>, vector<16x256xf32>
    %63 = arith.truncf %62 : vector<16x256xf32> to vector<16x256xbf16>
    %c240_i32 = arith.constant 240 : i32
    %64 = tpu.dynamic_rotate %13 by %c240_i32 dim 1 : vector<16x256xf32>, i32 -> vector<16x256xf32>
    %cst_21 = arith.constant 0.000000e+00 : f32
    %65 = vector.shape_cast %20 : vector<1x256xi1> to vector<1x256xi1>
    %66 = vector.broadcast %65 : vector<1x256xi1> to vector<16x256xi1>
    %67 = vector.broadcast %cst_21 : f32 to vector<16x256xf32>
    %68 = arith.select %66, %64, %67 : vector<16x256xi1>, vector<16x256xf32>
    %69 = arith.truncf %68 : vector<16x256xf32> to vector<16x256xbf16>
    %c239_i32 = arith.constant 239 : i32
    %70 = tpu.dynamic_rotate %13 by %c239_i32 dim 1 : vector<16x256xf32>, i32 -> vector<16x256xf32>
    %71 = arith.andi %20, %24 : vector<1x256xi1>
    %cst_22 = arith.constant 0.000000e+00 : f32
    %72 = vector.shape_cast %71 : vector<1x256xi1> to vector<1x256xi1>
    %73 = vector.broadcast %72 : vector<1x256xi1> to vector<16x256xi1>
    %74 = vector.broadcast %cst_22 : f32 to vector<16x256xf32>
    %75 = arith.select %73, %70, %74 : vector<16x256xi1>, vector<16x256xf32>
    %76 = arith.truncf %75 : vector<16x256xf32> to vector<16x256xbf16>
    %77 = tpu.concatenate %31, %37, %44, %50, %14, %56, %63, %69, %76 in 0 : vector<16x256xbf16>, vector<16x256xbf16>, vector<16x256xbf16>, vector<16x256xbf16>, vector<16x256xbf16>, vector<16x256xbf16>, vector<16x256xbf16>, vector<16x256xbf16>, vector<16x256xbf16> -> vector<144x256xbf16>
    %c0_23 = arith.constant 0 : index
    %c0_24 = arith.constant 0 : index
    %78 = vector.load %arg6[%c0_23, %c0_24] : memref<8x144xbf16, #tpu.memory_space<vmem>>, vector<8x144xbf16>
    %cst_25 = arith.constant dense<0.000000e+00> : vector<8x256xf32>
    %79 = tpu.matmul %78, %77, %cst_25 {dimension_numbers = #tpu.dot_dimension_numbers<[1], [0], [0], [1], [0, 0, 1, 1], [], []>} : vector<8x144xbf16>, vector<144x256xbf16>, vector<8x256xf32> -> vector<8x256xf32>
    %c0_26 = arith.constant 0 : index
    %c0_27 = arith.constant 0 : index
    %80 = vector.load %arg7[%c0_26, %c0_27] : memref<8x1xf32, #tpu.memory_space<vmem>>, vector<8x1xf32>
    %81 = vector.broadcast %80 : vector<8x1xf32> to vector<8x256xf32>
    %82 = arith.addf %79, %81 : vector<8x256xf32>
    %cst_28 = arith.constant 0.000000e+00 : f32
    %83 = vector.broadcast %cst_28 : f32 to vector<8x256xf32>
    %84 = arith.subf %83, %82 : vector<8x256xf32>
    %85 = math.exp %84 : vector<8x256xf32>
    %cst_29 = arith.constant 1.000000e+00 : f32
    %86 = vector.broadcast %cst_29 : f32 to vector<8x256xf32>
    %87 = arith.addf %86, %85 : vector<8x256xf32>
    %88 = tpu.reciprocal %87 {approx = true} : vector<8x256xf32> -> vector<8x256xf32>
    %89 = arith.mulf %82, %88 : vector<8x256xf32>
    %90 = arith.addf %0, %89 : vector<8x256xf32>
    %c0_30 = arith.constant 0 : index
    %c0_31 = arith.constant 0 : index
    %91 = vector.load %arg8[%c0_30, %c0_31] : memref<8x256xf32, #tpu.memory_space<vmem>>, vector<8x256xf32>
    tpu.vector_store %arg8[%c0_30, %c0_31], %90 {strides = array<i32>} : memref<8x256xf32, #tpu.memory_space<vmem>>, vector<8x256xf32>,
    return
  }
  func.func @transform_0(%arg0: i32) -> (i32, i32) {
    %c0_i32 = arith.constant 0 : i32
    %c0_i32_0 = arith.constant 0 : i32
    %c0_i32_1 = arith.constant 0 : i32
    return %c0_i32, %c0_i32_0 : i32, i32
  }
  func.func @transform_1(%arg0: i32) -> (i32, i32) {
    %c0_i32 = arith.constant 0 : i32
    %c0_i32_0 = arith.constant 0 : i32
    %c0_i32_1 = arith.constant 0 : i32
    return %c0_i32, %c0_i32_0 : i32, i32
  }
  func.func @transform_2(%arg0: i32) -> (i32, i32) {
    %c0_i32 = arith.constant 0 : i32
    %c0_i32_0 = arith.constant 0 : i32
    return %c0_i32, %arg0 : i32, i32
  }
  func.func @transform_3(%arg0: i32) -> (i32, i32) {
    %c0_i32 = arith.constant 0 : i32
    %c0_i32_0 = arith.constant 0 : i32
    %c0_i32_1 = arith.constant 0 : i32
    return %c0_i32, %c0_i32_0 : i32, i32
  }
  func.func @transform_4(%arg0: i32) -> (i32, i32) {
    %c0_i32 = arith.constant 0 : i32
    %c0_i32_0 = arith.constant 0 : i32
    %c0_i32_1 = arith.constant 0 : i32
    return %c0_i32, %c0_i32_0 : i32, i32
  }
  func.func @transform_5(%arg0: i32) -> (i32, i32) {
    %c0_i32 = arith.constant 0 : i32
    %c0_i32_0 = arith.constant 0 : i32
    %c0_i32_1 = arith.constant 0 : i32
    return %c0_i32, %c0_i32_0 : i32, i32
  }
  func.func @transform_6(%arg0: i32) -> (i32, i32) {
    %c0_i32 = arith.constant 0 : i32
    %c0_i32_0 = arith.constant 0 : i32
    %c0_i32_1 = arith.constant 0 : i32
    return %c0_i32, %c0_i32_0 : i32, i32
  }
  func.func @transform_7(%arg0: i32) -> (i32, i32) {
    %c0_i32 = arith.constant 0 : i32
    %c0_i32_0 = arith.constant 0 : i32
    return %c0_i32, %arg0 : i32, i32
  }
}

</mosaic_0001>

<bundles_post_ra>
// kernel: resblock_pallas.1
= control target key start
LH: loop header
LB: loop body
LE: loop exit
PB: predicated region body
PF: predicated region fallthrough
CT: control target
= control target key end

     0   :  { %s1015_s24 = smov 0   ;;  %s1358_s0 = inlined_call_operand.vmem [shape: s32[1,256], index: 0, kind: input, shape index: {}]   ;;  %s1359_s1 = inlined_call_operand.vmem [shape: s32[1,256], index: 1, kind: input, shape index: {}]   ;;  %s1360_s2 = inlined_call_operand.vmem [shape: f32[8,512], index: 2, kind: input, shape index: {}]   ;;  %s1361_s3 = inlined_call_operand.vmem [shape: bf16[16,8], index: 3, kind: input, shape index: {}]   ;;  %s1362_s4 = inlined_call_operand.vmem [shape: f32[16,1], index: 4, kind: input, shape index: {}]   ;;  %s1363_s5 = inlined_call_operand.vmem [shape: bf16[8,144], index: 5, kind: input, shape index: {}]   ;;  %s1364_s6 = inlined_call_operand.vmem [shape: f32[8,1], index: 6, kind: input, shape index: {}]   ;;  %s1365_s7 = inlined_call_operand.vmem [shape: f32[8,512], index: 7, kind: output, shape index: {}]  }
   0x1 LB: > { %s768_s25 = sadd.s32 4294967295, %s964_s24   ;;  %p772_p0 = scmp.ge.s32.totalorder %s964_s24, 1  ;;  %s964_s24 = sphi %s1015_s24, %s17_s24  }
   0x2   : > { %p238_p1 = scmp.lt.s32.totalorder %s964_s24, 3 }
   0x4   : > { %p239_p2 = pnand %p772_p0, %p238_p1 }
   0x5   : > { %s773_s26 = sshll.u32 (!%p239_p2), %s768_s25, 1  ;;  %v966_v0 = vmov (!%p239_p2), 0   ;;  %v289_v1 = vld [vmem:[%s1362_s4] sm:$0xff] (!%p239_p2)  ;;  %v290_v2 = vld [vmem:[%s1362_s4 + $0x8] sm:$0xff] (!%p239_p2)  ;;  %vm310_vm0 = vcmask (!%p239_p2), 1043456   ;;  %vm306_vm1 = vcmask (!%p239_p2), 64512   ;;  %v400_v50 = vlaneseq (!%p239_p2) }
   0x6   : > { %242 = sbr.rel (%p239_p2) target bundleno = 679 (0x2a7), region = 48  ;;  %p271_p3 = scmp.lt.s32.totalorder (!%p239_p2), %s773_s26, 3  ;;  %349 = vmatprep.mubr.bf16.mxu0 (!%p239_p2), %v966_v0  ;;  %850 = vset.pattern.permute.xlu0 (!%p239_p2), %v966_v0  ;;  %v931_v8 = vld [vmem:[%s1361_s3] sm:$0xff] (!%p239_p2)   ;;  %vm651_vm2 = vcmask (!%p239_p2), 130048  }
   0x7   : > { %293 = vperm.xlu0 (!%p239_p2), %850, %v289_v1   ;;  %s967_s14 = smov (!%p239_p2), 16   ;;  %s968_s15 = smov (!%p239_p2), 17   ;;  %v639_v47 = vld [vmem:[%s1364_s6] sm:$0xff] (!%p239_p2)  ;;  %v410_v53 = vshrl.u32 (!%p239_p2), %v400_v50, 7  ;;  %v1097_v60 = vand.u32 (!%p239_p2), 127, %v400_v50 }
   0x8   : > { %s969_s16 = smov (!%p239_p2), 15   ;;  %s970_s17 = smov (!%p239_p2), 1   ;;  %v1072_v48 = vld [vmem:[%s1363_s5] sm:$0xff] (!%p239_p2) }
   0x9   : > { %s971_s18 = smov (!%p239_p2), 127   ;;  %s972_s19 = smov (!%p239_p2), 113   ;;  %v781_v49 = vcombine.high (!%p239_p2), %v1072_v48, %v1072_v48  ;;  %v1079_v51 = vld [vmem:[%s1358_s0] sm:$0x3] (!%p239_p2)  ;;  %v1090_v54 = vsub.s32 (!%p239_p2), 1, %v410_v53  ;;  %v1092_v55 = vsub.s32 (!%p239_p2), 0, %v410_v53 }
   0xa   : > { %s973_s20 = smov (!%p239_p2), 112   ;;  %s974_s21 = smov (!%p239_p2), 111   ;;  %v1084_v52 = vld [vmem:[%s1359_s1] sm:$0x3] (!%p239_p2)  ;;  %vm388_vm3 = vcmp.ge.s32.totalorder (!%p239_p2), %v1079_v51, 1  ;;  %vm402_vm8 = vcmp.lt.s32.totalorder (!%p239_p2), %v1097_v60, 17 }
   0xb   : > { %298 = vperm.xlu0 (!%p239_p2), %850, %v290_v2   ;;  %830 = vmatprep.mubr.msk.bf16.mxu1 (!%p239_p2), %vm651_vm2, %v781_v49  ;;  %vm390_vm4 = vcmp.ge.s32.totalorder (!%p239_p2), %v1084_v52, 1  ;;  %vm391_vm6 = vcmp.lt.s32.totalorder (!%p239_p2), %v1084_v52, 15  ;;  %v438_v57 = vsel (!%p239_p2), %vm388_vm3, 1, %v966_v0  ;;  %vm433_vm11 = vcmp.lt.s32.totalorder (!%p239_p2), %v1097_v60, 16 }
   0xc   : > { %vm407_vm5 = vmand (!%p239_p2), %vm388_vm3, %vm390_vm4  ;;  %v446_v63 = vrot.slane (!%p239_p2), %v438_v57, %v1090_v54 }
   0xd   : > { %s1395_s26 = smov (!%p271_p3, %s773_s26), 3  ;;  %v408_v56 = vsel %vm407_vm5, 1, %v966_v0  ;;  %vm468_vm7 = vmand %vm388_vm3, %vm391_vm6 }
   0xe   : > { %s774_s8 = sshll.u32 %s1395_s26, 3  ;;  %v416_v61 = vrot.slane %v408_v56, %v1090_v54  ;;  %v412_v62 = vrot.slane %v408_v56, %v1092_v55  ;;  %v469_v1 = vsel %vm468_vm7, 1, %v966_v0  ;;  %vm1116_vm12 = vcmp.eq.s32.totalorder %v446_v63, 1 }
   0xf   : > { %s274_s11 = scalar_lea.vmem %s1360_s2, %s774_s8  ;;  %vm788_vm5 = vmpackc.low %vm1116_vm12, %vm1116_vm12  ;;  %s280_s12 = scalar_lea.vmem %s1365_s7, %s774_s8 }
  0x10   : > { %v1039_v3 = vld [vmem:[%s274_s11 + $0x8] sm:$0xff]  ;;  %v1041_v4 = vld [vmem:[%s274_s11] sm:$0xff]  ;;  %vm1106_vm9 = vcmp.eq.s32.totalorder %v416_v61, 1  ;;  %vm1110_vm10 = vcmp.eq.s32.totalorder %v412_v62, 1 }
  0x11   : > { %v288_v5 = vpack.c.bf16 %v1039_v3, %v1039_v3  ;;  %v287_v6 = vpack.c.bf16 %v1041_v4, %v1041_v4  ;;  %vm782_vm13 = vmpackc.low %vm1106_vm9, %vm1106_vm9 }
  0x12   : > { %vm785_vm14 = vmpackc.low %vm1110_vm10, %vm1110_vm10 }
  0x13   : > { %778 = vmatprep.subr.msk.bf16.mxu0 %vm310_vm0, %v288_v5  ;;  %v312_v7 = vsel %vm310_vm0, %v287_v6, 0  ;;  %vm389_vm0 = vcmp.lt.s32.totalorder %v1079_v51, 15 }
  0x14   : > { %318 = vmatpush1.bf16.msra.mxu0 %v312_v7  ;;  %vm559_vm10 = vmand %vm389_vm0, %vm390_vm4 }
  0x17   : > { %779 = vmatmul.mubr.msk.bf16.vlgmr.msra.gmra.mrb[0].mxu0 %vm306_vm1, %v931_v8  ;;  %v442_v8 = vrot.slane %v438_v57, %v1092_v55  ;;  %vm463_vm1 = vcmp.lt.s32.totalorder %v1097_v60, 15  ;;  %v529_v57 = vsel %vm391_vm6, 1, %v966_v0 }
  0x19   : > { %vm1138_vm15 = vcmp.eq.s32.totalorder %v442_v8, 1 }
  0x1a   : > { %vm791_vm7 = vmpackc.low %vm1138_vm15, %vm1138_vm15 }
  0x86   : > { %v294_v9 = vpop.permute.xlu0 %293 }
  0x8a   : > { %v299_v13 = vpop.permute.xlu0 %298 }
  0xea   : > { %v351_v10 = vpop.f32.mrb[0].mxu0 }
  0xeb   : > { %v352_v11 = vadd.f32 %v351_v10, %v294_v9  ;;  %v353_v12 = vpop.f32.mrb[1].mxu0 }
  0xec   : > { %v354_v14 = vadd.f32 %v353_v12, %v294_v9  ;;  %v355_v15 = vpop.f32.mrb[2].mxu0 }
  0xed   : > { %v360_v16 = vsub.f32 0.0, %v352_v11  ;;  %v356_v17 = vadd.f32 %v355_v15, %v299_v13  ;;  %v357_v18 = vpop.f32.mrb[3].mxu0  ;;  %v473_v15 = vrot.slane %v469_v1, %v1092_v55 }
  0xee   : > { %v361_v19 = vsub.f32 0.0, %v354_v14  ;;  %v358_v20 = vadd.f32 %v357_v18, %v299_v13  ;;  %v560_v13 = vsel %vm559_vm10, 1, %v966_v0 }
  0xef   : > { %v364_v21 = vmul.f32 1.442695, %v360_v16  ;;  %v362_v22 = vsub.f32 0.0, %v356_v17  ;;  %vm1151_vm3 = vcmp.eq.s32.totalorder %v473_v15, 1 }
  0xf0   : > { %v366_v23 = vmul.f32 1.442695, %v361_v19  ;;  %v363_v24 = vsub.f32 0.0, %v358_v20 }
  0xf1   : > { %934 = vpow2.f32 %v364_v21  ;;  %v368_v25 = vmul.f32 1.442695, %v362_v22 }
  0xf2   : > { %936 = vpow2.f32 %v366_v23  ;;  %v370_v26 = vmul.f32 1.442695, %v363_v24 }
  0xf3   : > { %938 = vpow2.f32 %v368_v25  ;;  %v499_v25 = vsel %vm390_vm4, 1, %v966_v0  ;;  %vm524_vm4 = vcmp.lt.s32.totalorder %v1097_v60, 127 }
  0xf4   : > { %940 = vpow2.f32 %v370_v26 }
  0xfb   : > { %v935_v27 = vpop.eup %934 }
  0xfc   : > { %v937_v28 = vpop.eup %936  ;;  %v372_v29 = vadd.f32 1.0, %v935_v27 }
  0xfd   : > { %v939_v30 = vpop.eup %938  ;;  %v373_v31 = vadd.f32 1.0, %v937_v28 }
  0xfe   : > { %v941_v32 = vpop.eup %940  ;;  %942 = vrcp.f32 %v372_v29  ;;  %v374_v33 = vadd.f32 1.0, %v939_v30 }
  0xff   : > { %944 = vrcp.f32 %v373_v31  ;;  %v375_v34 = vadd.f32 1.0, %v941_v32 }
 0x100   : > { %946 = vrcp.f32 %v374_v33 }
 0x101   : > { %948 = vrcp.f32 %v375_v34 }
 0x108   : > { %v943_v35 = vpop.eup %942 }
 0x109   : > { %v945_v36 = vpop.eup %944  ;;  %v1050_v39 = vmul.f32 %v943_v35, %v352_v11 }
 0x10a   : > { %v947_v37 = vpop.eup %946  ;;  %v1054_v41 = vmul.f32 %v945_v36, %v354_v14  ;;  %v477_v14 = vrot.slane %v469_v1, %v1090_v54 }
 0x10b   : > { %v949_v38 = vpop.eup %948  ;;  %v1052_v40 = vmul.f32 %v947_v37, %v356_v17 }
 0x10c   : > { %v1056_v42 = vmul.f32 %v949_v38, %v358_v20  ;;  %vm1147_vm2 = vcmp.eq.s32.totalorder %v477_v14, 1 }
 0x10d   : > { %v856_v43 = vpack.i.bf16 %v1052_v40, %v1050_v39  ;;  %v384_v46 = vpack.c.bf16 %v1052_v40, %v1050_v39  ;;  %vm794_vm9 = vmpackc.low %vm1147_vm2, %vm1147_vm2  ;;  %vm554_vm2 = vcmp.lt.s32.totalorder %v1097_v60, 113 }
 0x10e   : > { %v871_v44 = vpack.i.bf16 %v1056_v42, %v1054_v41  ;;  %v385_v45 = vpack.c.bf16 %v1056_v42, %v1054_v41 }
 0x10f   : > { %857 = vrot.lane.b32.xlu0 %v856_v43, %s967_s14  ;;  %852 = vrot.lane.b32.xlu1 %v856_v43, %s968_s15 }
 0x113   : > { %862 = vrot.lane.b32.xlu0 %v856_v43, %s969_s16  ;;  %872 = vrot.lane.b32.xlu1 %v871_v44, %s968_s15 }
 0x117   : > { %867 = vrot.lane.b32.xlu0 %v856_v43, %s970_s17  ;;  %877 = vrot.lane.b32.xlu1 %v871_v44, %s967_s14 }
 0x11b   : > { %892 = vrot.lane.b32.xlu0 %v856_v43, %s971_s18  ;;  %882 = vrot.lane.b32.xlu1 %v871_v44, %s969_s16 }
 0x11f   : > { %897 = vrot.lane.b32.xlu0 %v856_v43, %s972_s19  ;;  %887 = vrot.lane.b32.xlu1 %v871_v44, %s970_s17 }
 0x123   : > { %902 = vrot.lane.b32.xlu0 %v856_v43, %s973_s20  ;;  %912 = vrot.lane.b32.xlu1 %v871_v44, %s971_s18 }
 0x127   : > { %907 = vrot.lane.b32.xlu0 %v856_v43, %s974_s21  ;;  %917 = vrot.lane.b32.xlu1 %v871_v44, %s972_s19 }
 0x12b   : > { %642 = vperm.xlu0 %850, %v639_v47   ;;  %922 = vrot.lane.b32.xlu1 %v871_v44, %s973_s20  ;;  %v503_v47 = vrot.slane %v499_v25, %v1092_v55 }
 0x12f   : > { %927 = vrot.lane.b32.xlu1 %v871_v44, %s974_s21  ;;  %v507_v44 = vrot.slane %v499_v25, %v1090_v54 }
 0x131   : > { %vm1200_vm12 = vcmp.eq.s32.totalorder %v507_v44, 1 }
 0x181   : > { %v858_v58 = vpop.permute.xlu0 %857  ;;  %v853_v59 = vpop.permute.xlu1 %852 }
 0x182   : > { %v855_v9 = vunpack.i.h.bf16 %v853_v59  ;;  %v854_v10 = vunpack.i.l.bf16 %v853_v59  ;;  %v860_v26 = vunpack.i.h.bf16 %v858_v58  ;;  %v859_v27 = vunpack.i.l.bf16 %v858_v58 }
 0x185   : > { %v863_v2 = vpop.permute.xlu0 %862  ;;  %v873_v5 = vpop.permute.xlu1 %872 }
 0x186   : > { %v875_v11 = vunpack.i.h.bf16 %v873_v5  ;;  %v874_v12 = vunpack.i.l.bf16 %v873_v5  ;;  %v865_v49 = vunpack.i.h.bf16 %v863_v2  ;;  %v864_v50 = vunpack.i.l.bf16 %v863_v2 }
 0x188   : > { %v403_v16 = vsel %vm402_vm8, %v854_v10, %v874_v12  ;;  %v404_v17 = vsel %vm402_vm8, %v855_v9, %v875_v11  ;;  %v405_v18 = vsel %vm402_vm8, %v874_v12, %v854_v10  ;;  %v406_v19 = vsel %vm402_vm8, %v875_v11, %v855_v9 }
 0x189   : > { %v1133_v20 = vpop.permute.xlu0 %867  ;;  %v878_v21 = vpop.permute.xlu1 %877  ;;  %v783_v22 = vpack.c.bf16 %v404_v17, %v403_v16  ;;  %v786_v23 = vpack.c.bf16 %v406_v19, %v405_v18  ;;  %vm494_vm8 = vcmp.lt.s32.totalorder %v1097_v60, 1  ;;  %v537_v12 = vrot.slane %v529_v57, %v1090_v54 }
 0x18a   : > { %v880_v28 = vunpack.i.h.bf16 %v878_v21  ;;  %v879_v29 = vunpack.i.l.bf16 %v878_v21  ;;  %v870_v7 = vunpack.i.h.bf16 %v1133_v20  ;;  %v869_v8 = vunpack.i.l.bf16 %v1133_v20 }
 0x18b   : > { %784 = vmatprep.subr.msk.bf16.mxu1 %vm782_vm13, %v783_v22  ;;  %vm1204_vm13 = vcmp.eq.s32.totalorder %v503_v47, 1  ;;  %v533_v21 = vrot.slane %v529_v57, %v1092_v55  ;;  %v590_v22 = vsel %vm389_vm0, 1, %v966_v0 }
 0x18c   : > { %v435_v32 = vsel %vm433_vm11, %v860_v26, %v880_v28  ;;  %v437_v33 = vsel %vm433_vm11, %v880_v28, %v860_v26  ;;  %v434_v34 = vsel %vm433_vm11, %v859_v27, %v879_v29  ;;  %v436_v35 = vsel %vm433_vm11, %v879_v29, %v859_v27  ;;  %787 = vmatpush1.bf16.msk.msra.mxu1 %vm785_vm14, %v786_v23  ;;  %vm797_vm11 = vmpackc.low %vm1151_vm3, %vm1151_vm3 }
 0x18d   : > { %v789_v36 = vpack.c.bf16 %v435_v32, %v434_v34  ;;  %v792_v37 = vpack.c.bf16 %v437_v33, %v436_v35  ;;  %v1171_v38 = vpop.permute.xlu0 %892  ;;  %v883_v43 = vpop.permute.xlu1 %882  ;;  %vm800_vm14 = vmpackc.low %vm1200_vm12, %vm1200_vm12  ;;  %v568_v28 = vrot.slane %v560_v13, %v1090_v54  ;;  %vm1258_vm3 = vcmp.eq.s32.totalorder %v533_v21, 1 }
 0x18e   : > { %v885_v53 = vunpack.i.h.bf16 %v883_v43  ;;  %v884_v56 = vunpack.i.l.bf16 %v883_v43  ;;  %vm803_vm15 = vmpackc.low %vm1204_vm13, %vm1204_vm13  ;;  %v895_v23 = vunpack.i.h.bf16 %v1171_v38  ;;  %v894_v24 = vunpack.i.l.bf16 %v1171_v38 }
 0x18f   : > { %790 = vmatprep.subr.msk.bf16.mxu1 %vm788_vm5, %v789_v36  ;;  %v564_v34 = vrot.slane %v560_v13, %v1092_v55  ;;  %v598_v35 = vrot.slane %v590_v22, %v1090_v54  ;;  %vm620_vm5 = vmand %vm389_vm0, %vm391_vm6  ;;  %vm585_vm6 = vcmp.lt.s32.totalorder %v1097_v60, 112  ;;  %v594_v39 = vrot.slane %v590_v22, %v1092_v55 }
 0x190   : > { %v465_v58 = vsel %vm463_vm1, %v865_v49, %v885_v53  ;;  %v467_v59 = vsel %vm463_vm1, %v885_v53, %v865_v49  ;;  %v464_v61 = vsel %vm463_vm1, %v864_v50, %v884_v56  ;;  %v466_v62 = vsel %vm463_vm1, %v884_v56, %v864_v50  ;;  %793 = vmatpush1.bf16.msk.msra.mxu1 %vm791_vm7, %v792_v37  ;;  %vm809_vm0 = vmpackc.low %vm1258_vm3, %vm1258_vm3 }
 0x191   : > { %v795_v63 = vpack.c.bf16 %v465_v58, %v464_v61  ;;  %v798_v1 = vpack.c.bf16 %v467_v59, %v466_v62  ;;  %v888_v2 = vpop.permute.xlu1 %887  ;;  %v1210_v9 = vpop.permute.xlu0 %897  ;;  %vm1245_vm1 = vcmp.eq.s32.totalorder %v537_v12, 1  ;;  %v621_v47 = vsel %vm620_vm5, 1, %v966_v0 }
 0x192   : > { %v890_v10 = vunpack.i.h.bf16 %v888_v2  ;;  %v889_v11 = vunpack.i.l.bf16 %v888_v2  ;;  %v900_v36 = vunpack.i.h.bf16 %v1210_v9  ;;  %v899_v37 = vunpack.i.l.bf16 %v1210_v9  ;;  %vm806_vm7 = vmpackc.low %vm1245_vm1, %vm1245_vm1 }
 0x193   : > { %796 = vmatprep.subr.msk.bf16.mxu1 %vm794_vm9, %v795_v63  ;;  %vm1293_vm9 = vcmp.eq.s32.totalorder %v564_v34, 1  ;;  %vm1297_vm10 = vcmp.eq.s32.totalorder %v598_v35, 1  ;;  %v629_v63 = vrot.slane %v621_v47, %v1090_v54  ;;  %vm615_vm12 = vcmp.lt.s32.totalorder %v1097_v60, 111 }
 0x194   : > { %v496_v14 = vsel %vm494_vm8, %v870_v7, %v890_v10  ;;  %v498_v15 = vsel %vm494_vm8, %v890_v10, %v870_v7  ;;  %v495_v16 = vsel %vm494_vm8, %v869_v8, %v889_v11  ;;  %v497_v17 = vsel %vm494_vm8, %v889_v11, %v869_v8  ;;  %799 = vmatpush1.bf16.msk.msra.mxu1 %vm797_vm11, %v798_v1  ;;  %vm815_vm13 = vmpackc.low %vm1293_vm9, %vm1293_vm9 }
 0x195   : > { %v801_v18 = vpack.c.bf16 %v496_v14, %v495_v16  ;;  %v804_v19 = vpack.c.bf16 %v498_v15, %v497_v17  ;;  %v913_v20 = vpop.permute.xlu1 %912  ;;  %v903_v29 = vpop.permute.xlu0 %902  ;;  %vm1277_vm8 = vcmp.eq.s32.totalorder %v568_v28, 1  ;;  %v625_v7 = vrot.slane %v621_v47, %v1092_v55 }
 0x196   : > { %v915_v25 = vunpack.i.h.bf16 %v913_v20  ;;  %v914_v26 = vunpack.i.l.bf16 %v913_v20  ;;  %v905_v49 = vunpack.i.h.bf16 %v903_v29  ;;  %v904_v40 = vunpack.i.l.bf16 %v903_v29  ;;  %vm812_vm11 = vmpackc.low %vm1277_vm8, %vm1277_vm8 }
 0x197   : > { %802 = vmatprep.subr.msk.bf16.mxu1 %vm800_vm14, %v801_v18  ;;  %vm818_vm14 = vmpackc.low %vm1297_vm10, %vm1297_vm10  ;;  %vm630_vm3 = vcmp.eq.s32.totalorder %v625_v7, 1  ;;  %v780_v21 = vcombine.low %v1072_v48, %v1072_v48 }
 0x198   : > { %v528_v30 = vsel %vm524_vm4, %v915_v25, %v895_v23  ;;  %v527_v31 = vsel %vm524_vm4, %v914_v26, %v894_v24  ;;  %805 = vmatpush1.bf16.msk.msra.mxu1 %vm803_vm15, %v804_v19  ;;  %v526_v42 = vsel %vm524_vm4, %v895_v23, %v915_v25  ;;  %vm631_vm15 = vcmp.eq.s32.totalorder %v629_v63, 1  ;;  %vm827_vm5 = vmpackc.low %vm630_vm3, %vm630_vm3 }
 0x199   : > { %v918_v32 = vpop.permute.xlu1 %917  ;;  %663 = vmatprep.subr.bf16.mxu1 %v385_v45  ;;  %v525_v45 = vsel %vm524_vm4, %v894_v24, %v914_v26  ;;  %v807_v52 = vpack.c.bf16 %v528_v30, %v527_v31  ;;  %v908_v0 = vpop.permute.xlu0 %907  ;;  %vm1323_vm4 = vcmp.eq.s32.totalorder %v594_v39, 1 }
 0x19a   : > { %v920_v38 = vunpack.i.h.bf16 %v918_v32  ;;  %v919_v41 = vunpack.i.l.bf16 %v918_v32  ;;  %v910_v5 = vunpack.i.h.bf16 %v908_v0  ;;  %v909_v8 = vunpack.i.l.bf16 %v908_v0  ;;  %vm821_vm1 = vmpackc.low %vm1323_vm4, %vm1323_vm4 }
 0x19c   : > { %v558_v43 = vsel %vm554_vm2, %v920_v38, %v900_v36  ;;  %v557_v44 = vsel %vm554_vm2, %v919_v41, %v899_v37  ;;  %664 = vmatpush1.bf16.msra.mxu1 %v384_v46  ;;  %v810_v46 = vpack.c.bf16 %v526_v42, %v525_v45  ;;  %v556_v59 = vsel %vm554_vm2, %v900_v36, %v920_v38 }
 0x19d   : > { %v923_v50 = vpop.permute.xlu1 %922  ;;  %808 = vmatprep.subr.msk.bf16.mxu1 %vm806_vm7, %v807_v52  ;;  %v555_v61 = vsel %vm554_vm2, %v899_v37, %v919_v41  ;;  %v813_v62 = vpack.c.bf16 %v558_v43, %v557_v44  ;;  %vm824_vm2 = vmpackc.low %vm631_vm15, %vm631_vm15 }
 0x19e   : > { %v925_v57 = vunpack.i.h.bf16 %v923_v50  ;;  %v924_v58 = vunpack.i.l.bf16 %v923_v50  ;;  %v816_v9 = vpack.c.bf16 %v556_v59, %v555_v61 }
 0x1a0   : > { %v589_v1 = vsel %vm585_vm6, %v925_v57, %v905_v49  ;;  %v588_v2 = vsel %vm585_vm6, %v924_v58, %v904_v40  ;;  %811 = vmatpush1.bf16.msk.msra.mxu1 %vm809_vm0, %v810_v46  ;;  %v587_v12 = vsel %vm585_vm6, %v905_v49, %v925_v57  ;;  %v586_v13 = vsel %vm585_vm6, %v904_v40, %v924_v58 }
 0x1a1   : > { %v928_v6 = vpop.permute.xlu1 %927  ;;  %814 = vmatprep.subr.msk.bf16.mxu1 %vm812_vm11, %v813_v62  ;;  %v819_v14 = vpack.c.bf16 %v589_v1, %v588_v2  ;;  %v822_v16 = vpack.c.bf16 %v587_v12, %v586_v13 }
 0x1a2   : > { %v930_v10 = vunpack.i.h.bf16 %v928_v6  ;;  %v929_v11 = vunpack.i.l.bf16 %v928_v6 }
 0x1a4   : > { %v619_v15 = vsel %vm615_vm12, %v930_v10, %v910_v5  ;;  %v618_v55 = vsel %vm615_vm12, %v929_v11, %v909_v8  ;;  %817 = vmatpush1.bf16.msk.msra.mxu1 %vm815_vm13, %v816_v9  ;;  %v617_v17 = vsel %vm615_vm12, %v910_v5, %v930_v10  ;;  %v616_v18 = vsel %vm615_vm12, %v909_v8, %v929_v11 }
 0x1a5   : > { %820 = vmatprep.subr.msk.bf16.mxu1 %vm818_vm14, %v819_v14  ;;  %v825_v19 = vpack.c.bf16 %v619_v15, %v618_v55  ;;  %v828_v20 = vpack.c.bf16 %v617_v17, %v616_v18 }
 0x1a8   : > { %823 = vmatpush1.bf16.msk.msra.mxu1 %vm821_vm1, %v822_v16 }
 0x1a9   : > { %826 = vmatprep.subr.msk.bf16.mxu1 %vm824_vm2, %v825_v19 }
 0x1aa   : > { %v643_v22 = vpop.permute.xlu0 %642 }
 0x1ac   : > { %829 = vmatpush1.bf16.msk.msra.mxu1 %vm827_vm5, %v828_v20 }
 0x1af   : > { %688 = vmatmul.mubr.bf16.vlgmr.msra.gmra.mrb[0].mxu1 %v780_v21 }
 0x282   : > { %v689_v23 = vpop.f32.mrb[0].mxu1 }
 0x283   : > { %v690_v24 = vadd.f32 %v689_v23, %v643_v22  ;;  %v691_v25 = vpop.f32.mrb[1].mxu1 }
 0x284   : > { %v692_v26 = vadd.f32 %v691_v25, %v643_v22  ;;  %v693_v27 = vpop.f32.mrb[2].mxu1 }
 0x285   : > { %v696_v28 = vsub.f32 0.0, %v690_v24  ;;  %v694_v60 = vpop.f32.mrb[3].mxu1 }
 0x286   : > { %v697_v29 = vsub.f32 0.0, %v692_v26 }
 0x287   : > { %v698_v30 = vmul.f32 1.442695, %v696_v28 }
 0x288   : > { %v700_v31 = vmul.f32 1.442695, %v697_v29 }
 0x289   : > { %950 = vpow2.f32 %v698_v30 }
 0x28a   : > { %952 = vpow2.f32 %v700_v31 }
 0x293   : > { %v951_v32 = vpop.eup %950 }
 0x294   : > { %v953_v33 = vpop.eup %952  ;;  %v702_v34 = vadd.f32 1.0, %v951_v32 }
 0x295   : > { %v703_v48 = vadd.f32 1.0, %v953_v33 }
 0x296   : > { %954 = vrcp.f32 %v702_v34 }
 0x297   : > { %956 = vrcp.f32 %v703_v48 }
 0x2a0   : > { %v955_v35 = vpop.eup %954 }
 0x2a1   : > { %v957_v36 = vpop.eup %956  ;;  %v706_v37 = vmul.f32 %v955_v35, %v690_v24 }
 0x2a2   : > { %v707_v38 = vmul.f32 %v957_v36, %v692_v26 }
 0x2a3   : > { %v708_v41 = vadd.f32 %v706_v37, %v1041_v4 }
 0x2a4   : > { %v709_v42 = vadd.f32 %v707_v38, %v1039_v3 }
 0x2a5   : > { %710 = vst [vmem:[%s280_s12] sm:$0xff] %v708_v41 }
 0x2a6   : > { %711 = vst [vmem:[%s280_s12 + $0x8] sm:$0xff] %v709_v42 }
 0x2a7 PF: > { %s17_s24 = sadd.s32 1, %s964_s24  }
 0x2a8   : > { %p14_p4 = scmp.ge.s32.totalorder %s17_s24, 4  }
 0x2aa   :  { %16 = sbr.rel (!%p14_p4) target bundleno = 1 (0x1), region = 78 }

</bundles_post_ra>
